<compile_context>
chip_gen: v7x
topology: tpu7x:2x2x1
jax: 0.10.0
libtpu: 0.0.40
codegen_flags: <defaults>
</compile_context>

<pallas_src>
import jax
import jax.numpy as jnp
from jax.experimental import pallas as pl
from jax.experimental.pallas import tpu as pltpu


def fused_cnn_kernel(xp_ref, w1_ref, w2_ref, w3_ref, wf_ref, b_ref, o_ref):
    """One batch chunk per grid program.

    xp_ref: (BN, H+2, (W+2)*Cin) f32   zero-padded NHWC input, (W,C) flattened to lanes
    w1_ref: (3, (W+2)*Cin, W*C1) bf16  conv1 as 3 banded row-matmul weights (per kh)
    w2_ref: (C1, C2) bf16              conv2 center tap (exact on a 1x1 map)
    w3_ref: (C2, C3) bf16              conv3 center tap (exact on a 1x1 map)
    wf_ref: (C3, NCP) bf16             fc weight, output lanes padded to 128*k
    b_ref : (1, 384+NCP) f32           [b1@0 | b2@128 | b3@256 | bf@384]
    o_ref : (BN, 1, NCP) f32
    """
    bn, hp, wpc = xp_ref.shape
    hh = hp - 2                        # output height
    wc1 = w1_ref.shape[2]              # W * C1
    c1 = w2_ref.shape[0]
    c2 = w3_ref.shape[0]
    c3 = wf_ref.shape[0]
    ncp = wf_ref.shape[1]

    # ---- conv1 (pre-bias) as 3 row-shifted banded matmuls on the MXU --------
    # acc[n*hh + i, j*c1 + o] = sum_{kh,kw,c} xpad[n, c, i+kh, j+kw] * w1[o,c,kh,kw]
    acc = jnp.zeros((bn * hh, wc1), jnp.float32)
    for kh in range(3):
        rows = xp_ref[:, kh:kh + hh, :].reshape(bn * hh, wpc).astype(jnp.bfloat16)
        acc = acc + jnp.dot(rows, w1_ref[kh], preferred_element_type=jnp.float32)

    # ---- AdaptiveMaxPool2d((1,1)) commuted BEFORE bias+ReLU (exact) ---------
    #   max_hw(relu(conv + b)) == relu(max_hw(conv) + b)
    m = jnp.max(acc.reshape(bn, hh, wc1), axis=1)          # max over rows i -> (bn, W*C1)
    s = wc1 // 2
    while s >= c1:                                         # lane-rotation max tree over the
        m = jnp.maximum(m, pltpu.roll(m, shift=s, axis=1))  # W column groups (XLU, cheap)
        s //= 2
    pooled = m[:, :c1]                                     # (bn, C1): max over (i, j)
    a1 = jnp.maximum(pooled + b_ref[:, 0:c1], 0.0)

    # ---- conv2/conv3 on a 1x1 map == center-tap dense layers; pools are identity
    a2 = jnp.maximum(
        jnp.dot(a1.astype(jnp.bfloat16), w2_ref[...],
                preferred_element_type=jnp.float32) + b_ref[:, 128:128 + c2], 0.0)
    a3 = jnp.maximum(
        jnp.dot(a2.astype(jnp.bfloat16), w3_ref[...],
                preferred_element_type=jnp.float32) + b_ref[:, 256:256 + c3], 0.0)
    logits = (jnp.dot(a3.astype(jnp.bfloat16), wf_ref[...],
                      preferred_element_type=jnp.float32) + b_ref[:, 384:384 + ncp])
    o_ref[...] = logits[:, None, :]


def prepare_params(params, *, width):
    """One-time weight preprocessing into kernel-ready layout (hoisted out of forward)."""
    (w1, b1, w2, b2, w3, b3, wf, bf) = params
    # The algebraic rewrites are exact ONLY for 3x3 / stride-1 / pad-1 convs and
    # AdaptiveMaxPool2d((1,1)).
    assert w1.shape[-2:] == (3, 3) and w2.shape[-2:] == (3, 3) and w3.shape[-2:] == (3, 3)
    c1, cin = w1.shape[0], w1.shape[1]
    c2, c3 = w2.shape[0], w3.shape[0]
    nc = wf.shape[0]
    assert c1 <= 128 and c2 <= 128 and c3 <= 128       # packed-bias layout below
    # In-kernel lane-rotation max tree needs power-of-two widths.
    assert width > 0 and (width & (width - 1)) == 0 and (c1 & (c1 - 1)) == 0
    ncp = ((nc + 127) // 128) * 128                     # lane-dense fc output

    # conv1 -> 3 banded row-matmul weights (one per kernel row kh):
    #   band[kh, jp*cin + c, j*c1 + o] = w1[o, c, kh, jp - j]   for jp - j in {0,1,2}
    # so (one padded input row) @ band[kh] gives the kh-slice of the 3x3 conv for
    # every output column j and every output channel o at once.
    w1_t = jnp.transpose(w1, (2, 3, 1, 0))              # (kh, kw, cin, c1)
    band = jnp.zeros((3, (width + 2) * cin, width * c1), jnp.float32)
    for j in range(width):
        for kw in range(3):
            jp = j + kw
            band = band.at[:, jp * cin:(jp + 1) * cin,
                           j * c1:(j + 1) * c1].set(w1_t[:, kw])
    w1b = band.astype(jnp.bfloat16)

    # conv2/conv3 center taps (exact on a 1x1 map), (in, out) layout, bf16 for the MXU.
    w2c = jnp.transpose(w2[:, :, 1, 1]).astype(jnp.bfloat16)        # (c1, c2)
    w3c = jnp.transpose(w3[:, :, 1, 1]).astype(jnp.bfloat16)        # (c2, c3)
    # fc weight, zero-padded to a multiple of 128 output lanes (unmasked stores).
    wfm = jnp.zeros((c3, ncp), jnp.float32).at[:, :nc].set(jnp.transpose(wf))
    wfm = wfm.astype(jnp.bfloat16)

    # All biases packed into ONE f32 buffer (single DMA / VMEM tile); each segment
    # starts on a 128-lane boundary: [b1@0 | b2@128 | b3@256 | bf@384].
    bias = jnp.zeros((1, 384 + ncp), jnp.float32)
    bias = bias.at[0, 0:c1].set(b1)
    bias = bias.at[0, 128:128 + c2].set(b2)
    bias = bias.at[0, 256:256 + c3].set(b3)
    bias = bias.at[0, 384:384 + nc].set(bf)
    return (w1b, w2c, w3c, wfm, bias)


def simple_cnn_forward(x_nchw, prep, *, num_classes):
    (w1b, w2c, w3c, wfm, bias) = prep
    N, C, H, W = x_nchw.shape
    ncp = wfm.shape[1]

    # Tiny glue (one small fusion over ~KBs): NCHW -> NHWC, zero pad for padding=1,
    # flatten (W+2, C) into the lane dim so conv1 rows are MXU-ready.  The 9x
    # im2col expansion happens INSIDE the kernel; nothing inflated touches HBM.
    x = jnp.transpose(x_nchw, (0, 2, 3, 1))
    xp = jnp.pad(x, ((0, 0), (1, 1), (1, 1), (0, 0)))
    xp = xp.reshape(N, H + 2, (W + 2) * C)

    # Up to two batch chunks: keeps both v7x TensorCores busy via the "parallel"
    # grid axis; on v5e/v6e (1 TC) the extra grid step is ~0.35us.  Within a
    # chunk the sub-batch shares one conv1 matmul and one batched head (M = BN).
    G = 2 if N >= 2 else 1
    BN = pl.cdiv(N, G)
    Npad = G * BN
    if Npad != N:
        xp = jnp.pad(xp, ((0, Npad - N), (0, 0), (0, 0)))

    out = pl.pallas_call(
        fused_cnn_kernel,
        out_shape=jax.ShapeDtypeStruct((Npad, 1, ncp), jnp.float32),
        grid=(G,),
        in_specs=[
            pl.BlockSpec((BN, H + 2, (W + 2) * C), lambda i: (i, 0, 0)),  # input chunk
            pl.BlockSpec(w1b.shape, lambda i: (0, 0, 0)),                 # conv1 band (resident)
            pl.BlockSpec(w2c.shape, lambda i: (0, 0)),                    # conv2 center tap
            pl.BlockSpec(w3c.shape, lambda i: (0, 0)),                    # conv3 center tap
            pl.BlockSpec(wfm.shape, lambda i: (0, 0)),                    # fc weight (lane-padded)
            pl.BlockSpec(bias.shape, lambda i: (0, 0)),                   # packed biases
        ],
        out_specs=pl.BlockSpec((BN, 1, ncp), lambda i: (i, 0, 0)),
        compiler_params=pltpu.CompilerParams(
            dimension_semantics=("parallel",)),
    )(xp, w1b, w2c, w3c, wfm, bias)

    return out.reshape(Npad, ncp)[:N, :num_classes]


def reference_forward(x_nchw, params):
    """Pure-JAX f32 reference of the exact PyTorch forward semantics."""
    (w1, b1, w2, b2, w3, b3, wf, bf) = params
    x = jnp.transpose(x_nchw, (0, 2, 3, 1))
    w1_hwio = jnp.transpose(w1, (2, 3, 1, 0))
    y = jax.lax.conv_general_dilated(
        x, w1_hwio, (1, 1), "SAME", dimension_numbers=("NHWC", "HWIO", "NHWC"))
    y = jax.nn.relu(y + b1)
    y = jnp.max(y, axis=(1, 2))                        # AdaptiveMaxPool2d((1,1))
    y = jax.nn.relu(y @ w2[:, :, 1, 1].T + b2)         # conv2 on 1x1 map (+ identity pool)
    y = jax.nn.relu(y @ w3[:, :, 1, 1].T + b3)         # conv3 on 1x1 map (+ identity pool)
    return y @ wf.T + bf


def init_params(key, in_channels, num_classes):
    """Deterministic synthetic init (PyTorch-style uniform fan-in bounds)."""
    ks = jax.random.split(key, 8)

    def u(k, shape, fan_in):
        bound = 1.0 / jnp.sqrt(jnp.float32(fan_in))
        return jax.random.uniform(k, shape, jnp.float32, -bound, bound)

    w1 = u(ks[0], (32, in_channels, 3, 3), in_channels * 9)
    b1 = u(ks[1], (32,), in_channels * 9)
    w2 = u(ks[2], (64, 32, 3, 3), 32 * 9)
    b2 = u(ks[3], (64,), 32 * 9)
    w3 = u(ks[4], (128, 64, 3, 3), 64 * 9)
    b3 = u(ks[5], (128,), 64 * 9)
    wf = u(ks[6], (num_classes, 128), 128)
    bf = u(ks[7], (num_classes,), 128)
    return (w1, b1, w2, b2, w3, b3, wf, bf)


if __name__ == "__main__":
    key = jax.random.PRNGKey(0)
    pkey, xkey = jax.random.split(key)

    in_channels, num_classes = 4, 10
    N, H, W = 2, 16, 16

    params = init_params(pkey, in_channels, num_classes)
    prep = prepare_params(params, width=W)             # hoisted weight preprocessing
    x = jax.random.normal(xkey, (N, in_channels, H, W), jnp.float32)

    fwd = jax.jit(simple_cnn_forward, static_argnames=("num_classes",))
    out = jax.block_until_ready(fwd(x, prep, num_classes=num_classes))
    ref = jax.block_until_ready(reference_forward(x, params))

    assert out.shape == (N, num_classes), out.shape
    # Tolerance covers bf16 MXU inputs on conv1 AND the head (f32 accumulation).
    max_err = jnp.max(jnp.abs(out - ref))
    assert jnp.allclose(out, ref, atol=5e-3, rtol=5e-3), (
        f"mismatch vs pure-JAX reference: max abs err = {max_err}")
    print("KERNEL_OK")
</pallas_src>

<mosaic_0001>
module attributes {stable_mosaic.version = 11 : i64} {
  func.func @fused_cnn_kernel(%arg0: i32, %arg1: memref<1x18x72xf32, #tpu.memory_space<vmem>>, %arg2: memref<3x72x512xbf16, #tpu.memory_space<vmem>>, %arg3: memref<32x64xbf16, #tpu.memory_space<vmem>>, %arg4: memref<64x128xbf16, #tpu.memory_space<vmem>>, %arg5: memref<128x128xbf16, #tpu.memory_space<vmem>>, %arg6: memref<1x512xf32, #tpu.memory_space<vmem>>, %arg7: memref<1x1x128xf32, #tpu.memory_space<vmem>>) attributes {dimension_semantics = [#tpu.dimension_semantics<parallel>], iteration_bounds = array<i64: 2>, scalar_prefetch = 0 : i64, scratch_operands = 0 : i64, tpu.core_type = #tpu.core_type<tc>, window_params = [{transform_indices = @transform_0, window_bounds = array<i64: 1, 18, 72>}, {pipeline_mode = #tpu.pipeline_mode<synchronous>, transform_indices = @transform_1, window_bounds = array<i64: 3, 72, 512>}, {pipeline_mode = #tpu.pipeline_mode<synchronous>, transform_indices = @transform_2, window_bounds = array<i64: 32, 64>}, {pipeline_mode = #tpu.pipeline_mode<synchronous>, transform_indices = @transform_3, window_bounds = array<i64: 64, 128>}, {pipeline_mode = #tpu.pipeline_mode<synchronous>, transform_indices = @transform_4, window_bounds = array<i64: 128, 128>}, {pipeline_mode = #tpu.pipeline_mode<synchronous>, transform_indices = @transform_5, window_bounds = array<i64: 1, 512>}, {transform_indices = @transform_6, window_bounds = array<i64: 1, 1, 128>}]} {
    %cst = arith.constant 0.000000e+00 : f32
    %0 = vector.broadcast %cst : f32 to vector<16x512xf32>
    %c0 = arith.constant 0 : index
    %c0_0 = arith.constant 0 : index
    %c0_1 = arith.constant 0 : index
    %1 = vector.load %arg1[%c0, %c0_0, %c0_1] : memref<1x18x72xf32, #tpu.memory_space<vmem>>, vector<1x16x72xf32>
    %2 = vector.shape_cast %1 : vector<1x16x72xf32> to vector<16x72xf32>
    %3 = arith.truncf %2 : vector<16x72xf32> to vector<16x72xbf16>
    %c0_2 = arith.constant 0 : index
    %c0_3 = arith.constant 0 : index
    %c0_4 = arith.constant 0 : index
    %4 = vector.load %arg2[%c0_2, %c0_3, %c0_4] : memref<3x72x512xbf16, #tpu.memory_space<vmem>>, vector<1x72x512xbf16>
    %5 = vector.shape_cast %4 : vector<1x72x512xbf16> to vector<72x512xbf16>
    %cst_5 = arith.constant dense<0.000000e+00> : vector<16x512xf32>
    %6 = tpu.matmul %3, %5, %cst_5 {dimension_numbers = #tpu.dot_dimension_numbers<[1], [0], [0], [1], [0, 0, 1, 1], [], []>} : vector<16x72xbf16>, vector<72x512xbf16>, vector<16x512xf32> -> vector<16x512xf32>
    %7 = arith.addf %0, %6 : vector<16x512xf32>
    %c0_6 = arith.constant 0 : index
    %c1 = arith.constant 1 : index
    %c0_7 = arith.constant 0 : index
    %8 = vector.load %arg1[%c0_6, %c1, %c0_7] : memref<1x18x72xf32, #tpu.memory_space<vmem>>, vector<1x16x72xf32>
    %9 = vector.shape_cast %8 : vector<1x16x72xf32> to vector<16x72xf32>
    %10 = arith.truncf %9 : vector<16x72xf32> to vector<16x72xbf16>
    %c1_8 = arith.constant 1 : index
    %c0_9 = arith.constant 0 : index
    %c0_10 = arith.constant 0 : index
    %11 = vector.load %arg2[%c1_8, %c0_9, %c0_10] : memref<3x72x512xbf16, #tpu.memory_space<vmem>>, vector<1x72x512xbf16>
    %12 = vector.shape_cast %11 : vector<1x72x512xbf16> to vector<72x512xbf16>
    %cst_11 = arith.constant dense<0.000000e+00> : vector<16x512xf32>
    %13 = tpu.matmul %10, %12, %cst_11 {dimension_numbers = #tpu.dot_dimension_numbers<[1], [0], [0], [1], [0, 0, 1, 1], [], []>} : vector<16x72xbf16>, vector<72x512xbf16>, vector<16x512xf32> -> vector<16x512xf32>
    %14 = arith.addf %7, %13 : vector<16x512xf32>
    %c0_12 = arith.constant 0 : index
    %c2 = arith.constant 2 : index
    %c0_13 = arith.constant 0 : index
    %15 = vector.load %arg1[%c0_12, %c2, %c0_13] : memref<1x18x72xf32, #tpu.memory_space<vmem>>, vector<1x16x72xf32>
    %16 = vector.shape_cast %15 : vector<1x16x72xf32> to vector<16x72xf32>
    %17 = arith.truncf %16 : vector<16x72xf32> to vector<16x72xbf16>
    %c2_14 = arith.constant 2 : index
    %c0_15 = arith.constant 0 : index
    %c0_16 = arith.constant 0 : index
    %18 = vector.load %arg2[%c2_14, %c0_15, %c0_16] : memref<3x72x512xbf16, #tpu.memory_space<vmem>>, vector<1x72x512xbf16>
    %19 = vector.shape_cast %18 : vector<1x72x512xbf16> to vector<72x512xbf16>
    %cst_17 = arith.constant dense<0.000000e+00> : vector<16x512xf32>
    %20 = tpu.matmul %17, %19, %cst_17 {dimension_numbers = #tpu.dot_dimension_numbers<[1], [0], [0], [1], [0, 0, 1, 1], [], []>} : vector<16x72xbf16>, vector<72x512xbf16>, vector<16x512xf32> -> vector<16x512xf32>
    %21 = arith.addf %14, %20 : vector<16x512xf32>
    %22 = vector.shape_cast %21 : vector<16x512xf32> to vector<1x16x512xf32>
    %cst_18 = arith.constant dense<0xFF800000> : vector<1x512xf32>
    %23 = vector.multi_reduction <maximumf>, %22, %cst_18 [1] : vector<1x16x512xf32> to vector<1x512xf32>
    %c256_i32 = arith.constant 256 : i32
    %24 = tpu.dynamic_rotate %23 by %c256_i32 dim 1 : vector<1x512xf32>, i32 -> vector<1x512xf32>
    %25 = arith.maximumf %23, %24 : vector<1x512xf32>
    %c128_i32 = arith.constant 128 : i32
    %26 = tpu.dynamic_rotate %25 by %c128_i32 dim 1 : vector<1x512xf32>, i32 -> vector<1x512xf32>
    %27 = arith.maximumf %25, %26 : vector<1x512xf32>
    %c64_i32 = arith.constant 64 : i32
    %28 = tpu.dynamic_rotate %27 by %c64_i32 dim 1 : vector<1x512xf32>, i32 -> vector<1x512xf32>
    %29 = arith.maximumf %27, %28 : vector<1x512xf32>
    %c32_i32 = arith.constant 32 : i32
    %30 = tpu.dynamic_rotate %29 by %c32_i32 dim 1 : vector<1x512xf32>, i32 -> vector<1x512xf32>
    %31 = arith.maximumf %29, %30 : vector<1x512xf32>
    %32 = vector.extract_strided_slice %31 {offsets = [0, 0], sizes = [1, 32], strides = [1, 1]} : vector<1x512xf32> to vector<1x32xf32>
    %c0_19 = arith.constant 0 : index
    %c0_20 = arith.constant 0 : index
    %33 = vector.load %arg6[%c0_19, %c0_20] : memref<1x512xf32, #tpu.memory_space<vmem>>, vector<1x32xf32>
    %34 = arith.addf %32, %33 : vector<1x32xf32>
    %cst_21 = arith.constant 0.000000e+00 : f32
    %35 = vector.broadcast %cst_21 : f32 to vector<1x32xf32>
    %36 = arith.maximumf %34, %35 : vector<1x32xf32>
    %37 = arith.truncf %36 : vector<1x32xf32> to vector<1x32xbf16>
    %c0_22 = arith.constant 0 : index
    %c0_23 = arith.constant 0 : index
    %38 = vector.load %arg3[%c0_22, %c0_23] : memref<32x64xbf16, #tpu.memory_space<vmem>>, vector<32x64xbf16>
    %cst_24 = arith.constant dense<0.000000e+00> : vector<1x64xf32>
    %39 = tpu.matmul %37, %38, %cst_24 {dimension_numbers = #tpu.dot_dimension_numbers<[1], [0], [0], [1], [0, 0, 1, 1], [], []>} : vector<1x32xbf16>, vector<32x64xbf16>, vector<1x64xf32> -> vector<1x64xf32>
    %c0_25 = arith.constant 0 : index
    %c128 = arith.constant 128 : index
    %40 = vector.load %arg6[%c0_25, %c128] : memref<1x512xf32, #tpu.memory_space<vmem>>, vector<1x64xf32>
    %41 = arith.addf %39, %40 : vector<1x64xf32>
    %cst_26 = arith.constant 0.000000e+00 : f32
    %42 = vector.broadcast %cst_26 : f32 to vector<1x64xf32>
    %43 = arith.maximumf %41, %42 : vector<1x64xf32>
    %44 = arith.truncf %43 : vector<1x64xf32> to vector<1x64xbf16>
    %c0_27 = arith.constant 0 : index
    %c0_28 = arith.constant 0 : index
    %45 = vector.load %arg4[%c0_27, %c0_28] : memref<64x128xbf16, #tpu.memory_space<vmem>>, vector<64x128xbf16>
    %cst_29 = arith.constant dense<0.000000e+00> : vector<1x128xf32>
    %46 = tpu.matmul %44, %45, %cst_29 {dimension_numbers = #tpu.dot_dimension_numbers<[1], [0], [0], [1], [0, 0, 1, 1], [], []>} : vector<1x64xbf16>, vector<64x128xbf16>, vector<1x128xf32> -> vector<1x128xf32>
    %c0_30 = arith.constant 0 : index
    %c256 = arith.constant 256 : index
    %47 = vector.load %arg6[%c0_30, %c256] : memref<1x512xf32, #tpu.memory_space<vmem>>, vector<1x128xf32>
    %48 = arith.addf %46, %47 : vector<1x128xf32>
    %cst_31 = arith.constant 0.000000e+00 : f32
    %49 = vector.broadcast %cst_31 : f32 to vector<1x128xf32>
    %50 = arith.maximumf %48, %49 : vector<1x128xf32>
    %51 = arith.truncf %50 : vector<1x128xf32> to vector<1x128xbf16>
    %c0_32 = arith.constant 0 : index
    %c0_33 = arith.constant 0 : index
    %52 = vector.load %arg5[%c0_32, %c0_33] : memref<128x128xbf16, #tpu.memory_space<vmem>>, vector<128x128xbf16>
    %cst_34 = arith.constant dense<0.000000e+00> : vector<1x128xf32>
    %53 = tpu.matmul %51, %52, %cst_34 {dimension_numbers = #tpu.dot_dimension_numbers<[1], [0], [0], [1], [0, 0, 1, 1], [], []>} : vector<1x128xbf16>, vector<128x128xbf16>, vector<1x128xf32> -> vector<1x128xf32>
    %c0_35 = arith.constant 0 : index
    %c384 = arith.constant 384 : index
    %54 = vector.load %arg6[%c0_35, %c384] : memref<1x512xf32, #tpu.memory_space<vmem>>, vector<1x128xf32>
    %55 = arith.addf %53, %54 : vector<1x128xf32>
    %56 = vector.shape_cast %55 : vector<1x128xf32> to vector<1x1x128xf32>
    %c0_36 = arith.constant 0 : index
    %c0_37 = arith.constant 0 : index
    %c0_38 = arith.constant 0 : index
    %57 = vector.load %arg7[%c0_36, %c0_37, %c0_38] : memref<1x1x128xf32, #tpu.memory_space<vmem>>, vector<1x1x128xf32>
    tpu.vector_store %arg7[%c0_36, %c0_37, %c0_38], %56 {strides = array<i32>} : memref<1x1x128xf32, #tpu.memory_space<vmem>>, vector<1x1x128xf32>,
    return
  }
  func.func @transform_0(%arg0: i32) -> (i32, i32, i32) {
    %c0_i32 = arith.constant 0 : i32
    %c0_i32_0 = arith.constant 0 : i32
    %c0_i32_1 = arith.constant 0 : i32
    return %arg0, %c0_i32, %c0_i32_0 : i32, i32, i32
  }
  func.func @transform_1(%arg0: i32) -> (i32, i32, i32) {
    %c0_i32 = arith.constant 0 : i32
    %c0_i32_0 = arith.constant 0 : i32
    %c0_i32_1 = arith.constant 0 : i32
    %c0_i32_2 = arith.constant 0 : i32
    return %c0_i32, %c0_i32_0, %c0_i32_1 : i32, i32, i32
  }
  func.func @transform_2(%arg0: i32) -> (i32, i32) {
    %c0_i32 = arith.constant 0 : i32
    %c0_i32_0 = arith.constant 0 : i32
    %c0_i32_1 = arith.constant 0 : i32
    return %c0_i32, %c0_i32_0 : i32, i32
  }
  func.func @transform_3(%arg0: i32) -> (i32, i32) {
    %c0_i32 = arith.constant 0 : i32
    %c0_i32_0 = arith.constant 0 : i32
    %c0_i32_1 = arith.constant 0 : i32
    return %c0_i32, %c0_i32_0 : i32, i32
  }
  func.func @transform_4(%arg0: i32) -> (i32, i32) {
    %c0_i32 = arith.constant 0 : i32
    %c0_i32_0 = arith.constant 0 : i32
    %c0_i32_1 = arith.constant 0 : i32
    return %c0_i32, %c0_i32_0 : i32, i32
  }
  func.func @transform_5(%arg0: i32) -> (i32, i32) {
    %c0_i32 = arith.constant 0 : i32
    %c0_i32_0 = arith.constant 0 : i32
    %c0_i32_1 = arith.constant 0 : i32
    return %c0_i32, %c0_i32_0 : i32, i32
  }
  func.func @transform_6(%arg0: i32) -> (i32, i32, i32) {
    %c0_i32 = arith.constant 0 : i32
    %c0_i32_0 = arith.constant 0 : i32
    %c0_i32_1 = arith.constant 0 : i32
    return %arg0, %c0_i32, %c0_i32_0 : i32, i32, i32
  }
}

</mosaic_0001>

<bundles_post_ra>
// kernel: simple_cnn_forward.1
= control target key start
LH: loop header
LB: loop body
LE: loop exit
PB: predicated region body
PF: predicated region fallthrough
CT: control target
= control target key end

     0   :  { %11 = vsyncpa [#allocation3], 0  ;;  %s2078_s0 = inlined_call_operand.vmem [shape: f32[2,18,72], index: 0, kind: input, shape index: {}]   ;;  %s2079_s1 = inlined_call_operand.vmem [shape: bf16[3,72,512], index: 1, kind: input, shape index: {}]   ;;  %s2080_s2 = inlined_call_operand.vmem [shape: bf16[32,64], index: 2, kind: input, shape index: {}]   ;;  %s2081_s3 = inlined_call_operand.vmem [shape: bf16[64,128], index: 3, kind: input, shape index: {}]   ;;  %s2082_s4 = inlined_call_operand.vmem [shape: bf16[128,128], index: 4, kind: input, shape index: {}]   ;;  %s2083_s5 = inlined_call_operand.vmem [shape: f32[1,512], index: 5, kind: input, shape index: {}]   ;;  %s2084_s6 = inlined_call_operand.hbm [shape: f32[2,1,128], index: 6, kind: output, shape index: {}]  }
   0x1   :  { %13 = vsyncpa [#allocation3 + $0x1], 0  ;;  %s1710_s21 = smov 0   ;;  %s1712_s22 = smov 0  }
   0x2   :  { %s1714_s23 = smov 0   ;;  %s1716_s24 = smov 0  }
   0x3 LB: > { %s1731_s25 = sadd.s32 4294967295, %s1667_s24   ;;  %s1257_s26 = sadd.s32 4294967294, %s1667_s24   ;;  %s1667_s24 = sphi %s1716_s24, %s2090_s24   ;;  %s1663_s23 = sphi %s1714_s23, %s2089_s23   ;;  %s1659_s22 = sphi %s1712_s22, %s2088_s22   ;;  %s1655_s21 = sphi %s1710_s21, %s2087_s21  }
   0x4   : > { %s1735_s27 = sadd.s32 1, %s1667_s24   ;;  %s157_s28 = sadd.s32 1, %s1663_s23 }
   0x5   : > { %s154_s29 = ssub.s32 %s1667_s24, %s1735_s27  ;;  %p167_p0 = scmp.ne.s32.totalorder %s1663_s23, %s1659_s22 }
   0x6   : > { %p155_p1 = scmp.eq.s32.totalorder %s154_s29, 0  ;;  %p168_p2 = scmp.eq.s32.totalorder %s1731_s25, 1 }
   0x7   : > { %p173_p3 = scmp.ne.s32.totalorder %s1659_s22, %s1655_s21  ;;  %p174_p4 = scmp.eq.s32.totalorder %s1257_s26, 1 }
   0x8   : > { %s1746_s30 = scalar_select %p155_p1, %s1663_s23, %s157_s28  }
   0x9   : > { %p1748_p5 = por %p168_p2, %p167_p0  ;;  %p1752_p6 = por %p174_p4, %p173_p3 }
   0xa   : > { %p1260_p7 = scmp.ge.s32.totalorder %s1667_s24, 1  ;;  %p215_p8 = scmp.lt.s32.totalorder %s1667_s24, 3 }
   0xc   : > { %p216_p9 = pnand %p1260_p7, %p215_p8 }
   0xd   : > { %v1507_v0 = vld [vmem:[%s2079_s1 + $0x94] ss:$16 sps:$4 sm:$0xff] (!%p216_p9)   ;;  %v1509_v1 = vld [vmem:[%s2079_s1 + $0x9c] ss:$16 sps:$4 sm:$0xff] (!%p216_p9)   ;;  %v1669_v2 = vmov (!%p216_p9), 0   ;;  %p244_p10 = scmp.lt.s32.totalorder (!%p216_p9), %s1731_s25, 1 }
   0xe   : > { %219 = sbr.rel (%p216_p9) target bundleno = 1212 (0x4bc), region = 44  ;;  %432 = vmatprep.mubr.bf16.mxu0 (!%p216_p9), %v1669_v2  ;;  %475 = vmatprep.mubr.bf16.mxu1 (!%p216_p9), %v1669_v2  ;;  %v1511_v3 = vld [vmem:[%s2079_s1 + $0x90] ss:$16 sps:$4 sm:$0xff] (!%p216_p9)   ;;  %v1512_v4 = vld [vmem:[%s2079_s1 + $0x98] ss:$16 sps:$4 sm:$0xff] (!%p216_p9)   ;;  %vm387_vm0 = vcmask (!%p216_p9), 1043456  }
   0xf   : > { %400 = vmatprep.subr.bf16.mxu0 (!%p216_p9), %v1507_v0  ;;  %443 = vmatprep.subr.bf16.mxu1 (!%p216_p9), %v1509_v1  ;;  %v1513_v5 = vld [vmem:[%s2079_s1 + $0xb4] ss:$16 sps:$4 sm:$0xff] (!%p216_p9)   ;;  %v1515_v6 = vld [vmem:[%s2079_s1 + $0xbc] ss:$16 sps:$4 sm:$0xff] (!%p216_p9)   ;;  %v1517_v7 = vld [vmem:[%s2079_s1 + $0xb0] ss:$16 sps:$4 sm:$0xff] (!%p216_p9)  }
  0x10   : > { %401 = vmatpush1.bf16.msra.mxu0 (!%p216_p9), %v1511_v3  ;;  %444 = vmatpush1.bf16.msra.mxu1 (!%p216_p9), %v1512_v4  ;;  %v1518_v8 = vld [vmem:[%s2079_s1 + $0xb8] ss:$16 sps:$4 sm:$0xff] (!%p216_p9)   ;;  %v1519_v9 = vld [vmem:[%s2079_s1 + $0xd4] ss:$16 sps:$4 sm:$0xff] (!%p216_p9)   ;;  %v1521_v10 = vld [vmem:[%s2079_s1 + $0xdc] ss:$16 sps:$4 sm:$0xff] (!%p216_p9)  }
  0x11   : > { %402 = vmatprep.subr.bf16.mxu0 (!%p216_p9), %v1513_v5  ;;  %445 = vmatprep.subr.bf16.mxu1 (!%p216_p9), %v1515_v6  ;;  %v1523_v11 = vld [vmem:[%s2079_s1 + $0xd0] ss:$16 sps:$4 sm:$0xff] (!%p216_p9)   ;;  %v1524_v12 = vld [vmem:[%s2079_s1 + $0xd8] ss:$16 sps:$4 sm:$0xff] (!%p216_p9)   ;;  %v1525_v13 = vld [vmem:[%s2079_s1 + $0xf4] ss:$16 sps:$4 sm:$0xff] (!%p216_p9)  }
  0x12   : > { %v1527_v14 = vld [vmem:[%s2079_s1 + $0xfc] ss:$16 sps:$4 sm:$0xff] (!%p216_p9)   ;;  %v1278_v15 = vld [vmem:[%s2079_s1 + $0x110] sm:$0xff] (!%p216_p9)  ;;  %v1530_v18 = vld [vmem:[%s2079_s1 + $0xf8] ss:$16 sps:$4 sm:$0xff] (!%p216_p9)   ;;  %vm383_vm1 = vcmask (!%p216_p9), 588800  }
  0x13   : > { %v1279_v16 = vld [vmem:[%s2079_s1 + $0x118] sm:$0xff] (!%p216_p9)  ;;  %v1529_v17 = vld [vmem:[%s2079_s1 + $0xf0] ss:$16 sps:$4 sm:$0xff] (!%p216_p9)   ;;  %v1297_v19 = vcombine.high (!%p216_p9), %v1278_v15, %v1278_v15  ;;  %v1296_v21 = vcombine.low (!%p216_p9), %v1278_v15, %v1278_v15  ;;  %v1537_v23 = vld [vmem:[%s2079_s1 + $0x4] ss:$16 sps:$4 sm:$0xff] (!%p216_p9)   ;;  %vm1672_vm2 = vmmov (!%p216_p9), 0  }
  0x14   : > { %403 = vmatpush1.bf16.msra.mxu0 (!%p216_p9), %v1517_v7  ;;  %446 = vmatpush1.bf16.msra.mxu1 (!%p216_p9), %v1518_v8  ;;  %v1299_v20 = vcombine.high (!%p216_p9), %v1279_v16, %v1279_v16  ;;  %v1298_v22 = vcombine.low (!%p216_p9), %v1279_v16, %v1279_v16  ;;  %v1540_v28 = vld [vmem:[%s2079_s1 + $0xc] ss:$16 sps:$4 sm:$0xff] (!%p216_p9)   ;;  %v1535_v29 = vld [vmem:[%s2079_s1] ss:$16 sps:$4 sm:$0xff] (!%p216_p9)   ;;  %v1538_v30 = vld [vmem:[%s2079_s1 + $0x8] ss:$16 sps:$4 sm:$0xff] (!%p216_p9)  }
  0x15   : > { %s245_s29 = scalar_select %p244_p10, %s1731_s25, 1  ;;  %404 = vmatprep.subr.bf16.mxu0 %v1519_v9  ;;  %447 = vmatprep.subr.bf16.mxu1 %v1521_v10  ;;  %v389_v26 = vsel %vm387_vm0, %v1296_v21, 0  ;;  %v1543_v32 = vld [vmem:[%s2079_s1 + $0x24] ss:$16 sps:$4 sm:$0xff]   ;;  %v1546_v33 = vld [vmem:[%s2079_s1 + $0x2c] ss:$16 sps:$4 sm:$0xff]  }
  0x16   : > { %v395_v27 = vsel %vm387_vm0, %v1298_v22, 0  ;;  %v1541_v34 = vld [vmem:[%s2079_s1 + $0x20] ss:$16 sps:$4 sm:$0xff]   ;;  %v1544_v35 = vld [vmem:[%s2079_s1 + $0x28] ss:$16 sps:$4 sm:$0xff]   ;;  %s1673_s12 = smov 32  }
  0x17   : > { %s1462_s26 = smul.u32 24, %s245_s29  ;;  %v1549_v36 = vld [vmem:[%s2079_s1 + $0x44] ss:$16 sps:$4 sm:$0xff]   ;;  %v1552_v37 = vld [vmem:[%s2079_s1 + $0x4c] ss:$16 sps:$4 sm:$0xff]   ;;  %vm958_vm3 = vcmask 261120  }
  0x18   : > { %405 = vmatpush1.bf16.msra.mxu0 %v1523_v11  ;;  %448 = vmatpush1.bf16.msra.mxu1 %v1524_v12  ;;  %v1547_v38 = vld [vmem:[%s2079_s1 + $0x40] ss:$16 sps:$4 sm:$0xff]   ;;  %v1550_v39 = vld [vmem:[%s2079_s1 + $0x48] ss:$16 sps:$4 sm:$0xff]   ;;  %v1555_v40 = vld [vmem:[%s2079_s1 + $0x64] ss:$16 sps:$4 sm:$0xff]  }
  0x19   : > { %s1819_s19 = scalar_lea.vmem %s2078_s0, %s1462_s26  ;;  %406 = vmatprep.subr.bf16.mxu0 %v1525_v13  ;;  %449 = vmatprep.subr.bf16.mxu1 %v1527_v14  ;;  %v1558_v41 = vld [vmem:[%s2079_s1 + $0x6c] ss:$16 sps:$4 sm:$0xff]   ;;  %v269_v42 = vld [vmem:[%s2079_s1 + $0x80] sm:$0xff]  ;;  %v1556_v45 = vld [vmem:[%s2079_s1 + $0x68] ss:$16 sps:$4 sm:$0xff]   ;;  %vm1037_vm4 = vcmask 523264  }
  0x1a   : > { %v271_v24 = vld [vmem:[%s1819_s19 + $0x1] sm:$0xff]  ;;  %v272_v25 = vld [vmem:[%s1819_s19 + $0x9] sm:$0xff]  ;;  %v1321_v46 = vcombine.high %v269_v42, %v269_v42  ;;  %v1320_v48 = vcombine.low %v269_v42, %v269_v42  ;;  %s242_s13 = sand.u32 1, %s1659_s22   ;;  %s1386_s29 = sshll.u32 %s1731_s25, 4 }
  0x1b   : > { %v273_v31 = vpack.c.bf16 %v272_v25, %v271_v24  ;;  %v270_v43 = vld [vmem:[%s2079_s1 + $0x88] sm:$0xff]  ;;  %v1553_v44 = vld [vmem:[%s2079_s1 + $0x60] ss:$16 sps:$4 sm:$0xff]   ;;  %v1565_v50 = vld [vmem:[%s2079_s1 + $0x124] ss:$16 sps:$4 sm:$0xff]   ;;  %s243_s16 = scalar_lea.vmem [#allocation2], %s242_s13  ;;  %s2036_s28 = scalar_lea.hbm %s2084_s6, %s1386_s29 }
  0x1c   : > { %407 = vmatpush1.bf16.msra.mxu0 %v1529_v17  ;;  %450 = vmatpush1.bf16.msra.mxu1 %v1530_v18  ;;  %v1323_v47 = vcombine.high %v270_v43, %v270_v43  ;;  %v1322_v49 = vcombine.low %v270_v43, %v270_v43  ;;  %v1568_v51 = vld [vmem:[%s2079_s1 + $0x12c] ss:$16 sps:$4 sm:$0xff]   ;;  %v250_v52 = vld [vmem:[%s1819_s19] sm:$0xff]  ;;  %v580_v54 = vsel %vm387_vm0, %v1320_v48, 0  ;;  %v1566_v57 = vld [vmem:[%s2079_s1 + $0x128] ss:$16 sps:$4 sm:$0xff]  }
  0x1d   : > { %1300 = vmatprep.subr.msk.bf16.mxu0 %vm387_vm0, %v1297_v19  ;;  %1302 = vmatprep.subr.msk.bf16.mxu1 %vm387_vm0, %v1299_v20  ;;  %v251_v53 = vld [vmem:[%s1819_s19 + $0x8] sm:$0xff]  ;;  %v1563_v56 = vld [vmem:[%s2079_s1 + $0x120] ss:$16 sps:$4 sm:$0xff]   ;;  %v1571_v59 = vld [vmem:[%s2079_s1 + $0x144] ss:$16 sps:$4 sm:$0xff]   ;;  %s1202_s17 = sshll.u32 %s243_s16, 4  ;;  %s2038_s17 = int_to_ptr.vmem [resolvable:$true] %s1202_s17 }
  0x1e   : > { %v586_v55 = vsel %vm387_vm0, %v1322_v49, 0  ;;  %v252_v58 = vpack.c.bf16 %v251_v53, %v250_v52  ;;  %v1574_v60 = vld [vmem:[%s2079_s1 + $0x14c] ss:$16 sps:$4 sm:$0xff]   ;;  %v1569_v61 = vld [vmem:[%s2079_s1 + $0x140] ss:$16 sps:$4 sm:$0xff]   ;;  %s1605_s25 = scalar_lea.vmem %s2038_s17, 16 }
  0x1f   : > { %v1572_v62 = vld [vmem:[%s2079_s1 + $0x148] ss:$16 sps:$4 sm:$0xff]   ;;  %v1577_v63 = vld [vmem:[%s2079_s1 + $0x164] ss:$16 sps:$4 sm:$0xff]   ;;  %v1580_v0 = vld [vmem:[%s2079_s1 + $0x16c] ss:$16 sps:$4 sm:$0xff]   ;;  %p1606_p11 = scmp.ne.s32.totalorder %s2038_s17, %s1605_s25 }
  0x20   : > { %409 = vmatpush1.bf16.msra.mxu0 %v389_v26  ;;  %452 = vmatpush1.bf16.msra.mxu1 %v395_v27  ;;  %v1575_v1 = vld [vmem:[%s2079_s1 + $0x160] ss:$16 sps:$4 sm:$0xff]   ;;  %v1578_v3 = vld [vmem:[%s2079_s1 + $0x168] ss:$16 sps:$4 sm:$0xff]   ;;  %v1583_v4 = vld [vmem:[%s2079_s1 + $0x184] ss:$16 sps:$4 sm:$0xff]  }
  0x21   : > { %591 = vmatprep.subr.bf16.mxu0 %v1537_v23  ;;  %634 = vmatprep.subr.bf16.mxu1 %v1540_v28  ;;  %v1344_v5 = vld [vmem:[%s2079_s1 + $0x1a0] sm:$0xff]  ;;  %v1345_v6 = vld [vmem:[%s2079_s1 + $0x1a8] sm:$0xff]  ;;  %p1607_p12 = pnand %p1606_p11, %p1748_p5  ;;  %s1674_s26 = smov [#allocation2]  }
  0x22   : > { %v1581_v7 = vld [vmem:[%s2079_s1 + $0x180] ss:$16 sps:$4 sm:$0xff]   ;;  %v1584_v8 = vld [vmem:[%s2079_s1 + $0x188] ss:$16 sps:$4 sm:$0xff]   ;;  %v1363_v9 = vcombine.high %v1344_v5, %v1344_v5  ;;  %v1365_v10 = vcombine.high %v1345_v6, %v1345_v6  ;;  %v1362_v11 = vcombine.low %v1344_v5, %v1344_v5  ;;  %v1364_v12 = vcombine.low %v1345_v6, %v1345_v6  ;;  %s1609_s9 = sshll.u32 %s1674_s26, 4  ;;  %s1610_s9 = int_to_ptr.vmem [resolvable:$false] %s1609_s9 }
  0x23   : > { %1301 = vmatmul.mubr.msk.bf16.vlgmr.msra.gmra.mrb[0].mxu0 %vm383_vm1, %v273_v31  ;;  %1303 = vmatmul.mubr.msk.bf16.vlgmr.msra.gmra.mrb[0].mxu1 %vm383_vm1, %v273_v31  ;;  %v677_v13 = vld [vmem:[%s1819_s19 + $0x2] sm:$0xff]  ;;  %v678_v14 = vld [vmem:[%s1819_s19 + $0xa] sm:$0xff]  ;;  %s1671_s19 = smov 64   ;;  %p1608_p13 = pneg %p1607_p12 }
  0x24   : > { %592 = vmatpush1.bf16.msra.mxu0 %v1535_v29  ;;  %635 = vmatpush1.bf16.msra.mxu1 %v1538_v30  ;;  %v793_v15 = vsel %vm387_vm0, %v1362_v11, 0  ;;  %v799_v16 = vsel %vm387_vm0, %v1364_v12, 0  ;;  %v679_v17 = vpack.c.bf16 %v678_v14, %v677_v13  ;;  %v1594_v5 = vld [vmem:[%s2081_s3 + $0x8] sm:$0xff]   ;;  %v1595_v6 = vld [vmem:[%s2081_s3 + $0x10] sm:$0xff]   ;;  %v1600_v11 = vld [vmem:[%s2082_s4 + $0x18] sm:$0xff]   ;;  %s1611_s10 = scalar_lea.vmem %s1610_s9, 32  ;;  %p1612_p0 = scmp.lt.s32.totalorder %s2038_s17, %s1610_s9 }
  0x25   : > { %593 = vmatprep.subr.bf16.mxu0 %v1543_v32  ;;  %636 = vmatprep.subr.bf16.mxu1 %v1546_v33  ;;  %v1601_v12 = vld [vmem:[%s2082_s4 + $0x20] sm:$0xff]   ;;  %v1602_v13 = vld [vmem:[%s2082_s4 + $0x28] sm:$0xff]   ;;  %p1613_p1 = scmp.lt.s32.totalorder %s1611_s10, %s1605_s25 }
  0x26   : > { %623 = vmatprep.mubr.bf16.mxu0 %v1669_v2  ;;  %666 = vmatprep.mubr.bf16.mxu1 %v1669_v2  ;;  %v945_v14 = vld [vmem:[%s2083_s5 + $0x1] sm:$0x1] }
  0x27   : > { %p1614_p2 = por %p1613_p1, %p1612_p0 }
  0x28   : > { %594 = vmatpush1.bf16.msra.mxu0 %v1541_v34  ;;  %637 = vmatpush1.bf16.msra.mxu1 %v1544_v35 }
  0x29   : > { %595 = vmatprep.subr.bf16.mxu0 %v1549_v36  ;;  %638 = vmatprep.subr.bf16.mxu1 %v1552_v37  ;;  %p1615_p3 = pnand %p1614_p2, %p1608_p13 }
  0x2c   : > { %596 = vmatpush1.bf16.msra.mxu0 %v1547_v38  ;;  %639 = vmatpush1.bf16.msra.mxu1 %v1550_v39 }
  0x2d   : > { %597 = vmatprep.subr.bf16.mxu0 %v1555_v40  ;;  %640 = vmatprep.subr.bf16.mxu1 %v1558_v41 }
  0x30   : > { %598 = vmatpush1.bf16.msra.mxu0 %v1553_v44  ;;  %641 = vmatpush1.bf16.msra.mxu1 %v1556_v45 }
  0x31   : > { %1324 = vmatprep.subr.msk.bf16.mxu0 %vm387_vm0, %v1321_v46  ;;  %1326 = vmatprep.subr.msk.bf16.mxu1 %vm387_vm0, %v1323_v47  ;;  %v1670_v46 = vmov 0.0  }
  0x34   : > { %600 = vmatpush1.bf16.msra.mxu0 %v580_v54  ;;  %643 = vmatpush1.bf16.msra.mxu1 %v586_v55 }
  0x35   : > { %804 = vmatprep.subr.bf16.mxu0 %v1565_v50  ;;  %847 = vmatprep.subr.bf16.mxu1 %v1568_v51 }
  0x37   : > { %1325 = vmatmul.mubr.msk.bf16.vlgmr.msra.gmra.mrb[0].mxu0 %vm383_vm1, %v252_v58  ;;  %1327 = vmatmul.mubr.msk.bf16.vlgmr.msra.gmra.mrb[0].mxu1 %vm383_vm1, %v252_v58  ;;  %v1591_v58 = vld [vmem:[%s2080_s2] sm:$0xff]  }
  0x38   : > { %805 = vmatpush1.bf16.msra.mxu0 %v1563_v56  ;;  %848 = vmatpush1.bf16.msra.mxu1 %v1566_v57 }
  0x39   : > { %806 = vmatprep.subr.bf16.mxu0 %v1571_v59  ;;  %849 = vmatprep.subr.bf16.mxu1 %v1574_v60  ;;  %v1592_v59 = vld [vmem:[%s2080_s2 + $0x8] sm:$0xff]  }
  0x3a   : > { %836 = vmatprep.mubr.bf16.mxu0 %v1669_v2  ;;  %879 = vmatprep.mubr.bf16.mxu1 %v1669_v2  ;;  %v1586_v2 = vld [vmem:[%s2079_s1 + $0x18c] ss:$16 sps:$4 sm:$0xff]  }
  0x3c   : > { %807 = vmatpush1.bf16.msra.mxu0 %v1569_v61  ;;  %850 = vmatpush1.bf16.msra.mxu1 %v1572_v62  ;;  %v937_v62 = vld [vmem:[%s2083_s5] sm:$0x1] }
  0x3d   : > { %808 = vmatprep.subr.bf16.mxu0 %v1577_v63  ;;  %851 = vmatprep.subr.bf16.mxu1 %v1580_v0 }
  0x40   : > { %809 = vmatpush1.bf16.msra.mxu0 %v1575_v1  ;;  %852 = vmatpush1.bf16.msra.mxu1 %v1578_v3 }
  0x41   : > { %810 = vmatprep.subr.bf16.mxu0 %v1583_v4  ;;  %853 = vmatprep.subr.bf16.mxu1 %v1586_v2  ;;  %v1593_v4 = vld [vmem:[%s2081_s3] sm:$0xff]  }
  0x44   : > { %811 = vmatpush1.bf16.msra.mxu0 %v1581_v7  ;;  %854 = vmatpush1.bf16.msra.mxu1 %v1584_v8  ;;  %v1596_v7 = vld [vmem:[%s2081_s3 + $0x18] sm:$0xff]   ;;  %v1597_v8 = vld [vmem:[%s2082_s4] sm:$0xff]  }
  0x45   : > { %1366 = vmatprep.subr.msk.bf16.mxu0 %vm387_vm0, %v1363_v9  ;;  %1368 = vmatprep.subr.msk.bf16.mxu1 %vm387_vm0, %v1365_v10  ;;  %v1598_v9 = vld [vmem:[%s2082_s4 + $0x8] sm:$0xff]   ;;  %v1599_v10 = vld [vmem:[%s2082_s4 + $0x10] sm:$0xff]  }
  0x48   : > { %813 = vmatpush1.bf16.msra.mxu0 %v793_v15  ;;  %856 = vmatpush1.bf16.msra.mxu1 %v799_v16 }
  0x49   : > { %1406 = vmatprep.subr.bf16.mxu1 %v1670_v46  ;;  %1426 = vmatprep.subr.bf16.mxu0 %v1670_v46 }
  0x4b   : > { %1367 = vmatmul.mubr.msk.bf16.vlgmr.msra.gmra.mrb[0].mxu0 %vm383_vm1, %v679_v17  ;;  %1369 = vmatmul.mubr.msk.bf16.vlgmr.msra.gmra.mrb[0].mxu1 %vm383_vm1, %v679_v17 }
  0x4c   : > { %1407 = vmatpush3.bf16.msra.mxu1 %v1591_v58  ;;  %1410 = vmatprep.mubr.msk.bf16.mxu1 %vm1672_vm2, %v1670_v46 }
  0x4d   : > { %1408 = vmatprep.subr.bf16.mxu1 %v1670_v46  ;;  %1442 = vmatprep.mubr.msk.bf16.mxu0 %vm1672_vm2, %v1670_v46 }
  0x4e   : > { %1427 = vmatpush3.bf16.msra.mxu0 %v1597_v8 }
  0x4f   : > { %1428 = vmatprep.subr.bf16.mxu0 %v1670_v46 }
  0x50   : > { %1409 = vmatpush3.bf16.msra.mxu1 %v1592_v59 }
  0x51   : > { %1414 = vmatprep.subr.bf16.mxu1 %v1670_v46 }
  0x52   : > { %1429 = vmatpush3.bf16.msra.mxu0 %v1598_v9 }
  0x53   : > { %1430 = vmatprep.subr.bf16.mxu0 %v1670_v46 }
  0x56   : > { %1431 = vmatpush3.bf16.msra.mxu0 %v1599_v10 }
  0x57   : > { %1432 = vmatprep.subr.bf16.mxu0 %v1670_v46 }
  0x5a   : > { %1433 = vmatpush3.bf16.msra.mxu0 %v1600_v11 }
  0x5b   : > { %1434 = vmatprep.subr.bf16.mxu0 %v1670_v46 }
  0x5e   : > { %1435 = vmatpush3.bf16.msra.mxu0 %v1601_v12 }
  0x5f   : > { %1436 = vmatprep.subr.bf16.mxu0 %v1670_v46 }
  0x62   : > { %1437 = vmatpush3.bf16.msra.mxu0 %v1602_v13 }
  0x63   : > { %1438 = vmatprep.subr.bf16.mxu0 %v1670_v46 }
 0x11e   : > { %v838_v18 = vpop.f32.mrb[0].mxu0  ;;  %v881_v19 = vpop.f32.mrb[0].mxu1 }
 0x11f   : > { %v840_v20 = vpop.f32.mrb[1].mxu0  ;;  %v883_v21 = vpop.f32.mrb[1].mxu1 }
 0x120   : > { %v842_v22 = vpop.f32.mrb[2].mxu0  ;;  %v885_v23 = vpop.f32.mrb[2].mxu1 }
 0x121   : > { %v898_v24 = vmax.f32 %v838_v18, %v842_v22  ;;  %v912_v25 = vmax.f32 %v881_v19, %v885_v23  ;;  %v844_v26 = vpop.f32.mrb[3].mxu0  ;;  %v887_v27 = vpop.f32.mrb[3].mxu1  ;;  %v1603_v22 = vld [vmem:[%s2082_s4 + $0x30] sm:$0xff]   ;;  %v1604_v23 = vld [vmem:[%s2082_s4 + $0x38] sm:$0xff]  }
 0x122   : > { %v905_v28 = vmax.f32 %v840_v20, %v844_v26  ;;  %v919_v29 = vmax.f32 %v883_v21, %v887_v27  ;;  %1439 = vmatpush3.bf16.msra.mxu0 %v1603_v22 }
 0x123   : > { %v899_v30 = vrot.slane %v898_v24, 4  ;;  %v913_v31 = vrot.slane %v912_v25, 4  ;;  %1440 = vmatprep.subr.bf16.mxu0 %v1670_v46 }
 0x124   : > { %v906_v32 = vrot.slane %v905_v28, 4  ;;  %v920_v33 = vrot.slane %v919_v29, 4 }
 0x125   : > { %v900_v34 = vmax.f32 %v898_v24, %v899_v30  ;;  %v914_v35 = vmax.f32 %v912_v25, %v913_v31  ;;  %v1012_v24 = vld [vmem:[%s2083_s5 + $0x2] sm:$0x1] }
 0x126   : > { %v907_v36 = vmax.f32 %v905_v28, %v906_v32  ;;  %v921_v37 = vmax.f32 %v919_v29, %v920_v33  ;;  %1441 = vmatpush3.bf16.msra.mxu0 %v1604_v23  ;;  %v1099_v32 = vld [vmem:[%s2083_s5 + $0x3] sm:$0x1] }
 0x127   : > { %v901_v38 = vrot.slane %v900_v34, 2  ;;  %v915_v39 = vrot.slane %v914_v35, 2 }
 0x128   : > { %v908_v40 = vrot.slane %v907_v36, 2  ;;  %v922_v41 = vrot.slane %v921_v37, 2 }
 0x129   : > { %v902_v42 = vmax.f32 %v900_v34, %v901_v38  ;;  %v916_v43 = vmax.f32 %v914_v35, %v915_v39 }
 0x12a   : > { %v909_v44 = vmax.f32 %v907_v36, %v908_v40  ;;  %v923_v45 = vmax.f32 %v921_v37, %v922_v41 }
 0x12b   : > { %v903_v47 = vrot.slane %v902_v42, 1  ;;  %v917_v48 = vrot.slane %v916_v43, 1 }
 0x12c   : > { %v910_v49 = vrot.slane %v909_v44, 1  ;;  %v924_v50 = vrot.slane %v923_v45, 1 }
 0x12d   : > { %v904_v51 = vmax.f32 %v902_v42, %v903_v47  ;;  %v918_v52 = vmax.f32 %v916_v43, %v917_v48 }
 0x12e   : > { %v911_v53 = vmax.f32 %v909_v44, %v910_v49  ;;  %v925_v54 = vmax.f32 %v923_v45, %v924_v50 }
 0x12f   : > { %v926_v55 = vmax.f32 %v904_v51, %v918_v52 }
 0x130   : > { %v927_v56 = vmax.f32 %v911_v53, %v925_v54 }
 0x132   : > { %v928_v57 = vmax.f32 %v926_v55, %v927_v56 }
 0x134   : > { %929 = vrot.lane.b32.xlu0 %v928_v57, %s1671_s19  ;;  %s1190_s19 = scalar_lea.sflag [#allocation3], %s242_s13 }
 0x1a6   : > { %v930_v60 = vpop.permute.xlu0 %929 }
 0x1a7   : > { %v933_v61 = vmax.f32 %v928_v57, %v930_v60 }
 0x1a9   : > { %934 = vrot.lane.b32.xlu0 %v933_v61, %s1673_s12 }
 0x21b   : > { %v935_v63 = vpop.permute.xlu0 %934 }
 0x21c   : > { %v936_v0 = vmax.f32 %v933_v61, %v935_v63 }
 0x21e   : > { %v938_v1 = vadd.f32 %v937_v62, %v936_v0 }
 0x220   : > { %v939_v3 = vmax.f32 %v938_v1, 0.0 }
 0x222   : > { %v940_v2 = vpack.c.bf16 %v939_v3, %v939_v3 }
 0x224   : > { %1411 = vmatmul.mubr.msk.bf16.vlgmr.msra.gmra.mrb[4].mxu1 %vm958_vm3, %v940_v2 }
 0x225   : > { %1415 = vmatpush3.bf16.msra.mxu1 %v1593_v4  ;;  %1422 = vmatprep.mubr.msk.bf16.mxu1 %vm1672_vm2, %v1670_v46 }
 0x226   : > { %1416 = vmatprep.subr.bf16.mxu1 %v1670_v46 }
 0x229   : > { %1417 = vmatpush3.bf16.msra.mxu1 %v1594_v5 }
 0x22a   : > { %1418 = vmatprep.subr.bf16.mxu1 %v1670_v46 }
 0x22d   : > { %1419 = vmatpush3.bf16.msra.mxu1 %v1595_v6 }
 0x22e   : > { %1420 = vmatprep.subr.bf16.mxu1 %v1670_v46 }
 0x231   : > { %1421 = vmatpush3.bf16.msra.mxu1 %v1596_v7 }
 0x2f7   : > { %v996_v15 = vpop.f32.mrb[4].mxu1 }
 0x2f8   : > { %v997_v16 = vadd.f32 %v996_v15, %v945_v14  ;;  %v1412_v17 = vpop.f32.mrb[5].mxu1 }
 0x2f9   : > { %v999_v18 = vpop.f32.mrb[6].mxu1 }
 0x2fa   : > { %v1002_v19 = vmax.f32 %v997_v16, 0.0  ;;  %v1413_v20 = vpop.f32.mrb[7].mxu1 }
 0x2fc   : > { %v1003_v21 = vpack.c.bf16 %v1002_v19, %v1002_v19 }
 0x2fe   : > { %1423 = vmatmul.mubr.msk.bf16.vlgmr.msra.gmra.mrb[8].mxu1 %vm1037_vm4, %v1003_v21 }
 0x3d1   : > { %v1075_v25 = vpop.f32.mrb[8].mxu1 }
 0x3d2   : > { %v1076_v26 = vadd.f32 %v1075_v25, %v1012_v24  ;;  %v1424_v27 = vpop.f32.mrb[9].mxu1 }
 0x3d3   : > { %v1078_v28 = vpop.f32.mrb[10].mxu1 }
 0x3d4   : > { %v1081_v29 = vmax.f32 %v1076_v26, 0.0  ;;  %v1425_v30 = vpop.f32.mrb[11].mxu1 }
 0x3d6   : > { %v1082_v31 = vpack.c.bf16 %v1081_v29, %v1081_v29 }
 0x3d8   : > { %1443 = vmatmul.mubr.bf16.vlgmr.msra.gmra.mrb[4].mxu0 %v1082_v31 }
 0x4ab   : > { %v1182_v33 = vpop.f32.mrb[4].mxu0 }
 0x4ac   : > { %v1183_v34 = vadd.f32 %v1182_v33, %v1099_v32  ;;  %v1444_v35 = vpop.f32.mrb[5].mxu0 }
 0x4ad   : > { %v1185_v36 = vpop.f32.mrb[6].mxu0 }
 0x4ae   : > { %1188 = vst [vmem:[%s243_s16] sm:$0x1] %v1183_v34  ;;  %v1445_v37 = vpop.f32.mrb[7].mxu0 }
 0x4af   : > { %1618 = shalt.err (!%p1615_p3)
}
 0x4b0   : > { %s1619_s11 = scalar_lea.hbm %s2036_s28, 16  ;;  %s1623_s14 = scalar_lea.hbm %s2084_s6, 32 }
 0x4b1   : > { %p1620_p4 = scmp.ne.s32.totalorder %s2036_s28, %s1619_s11  ;;  %p1624_p9 = scmp.lt.u32.totalorder %s2036_s28, %s2084_s6 }
 0x4b2   : > { %p1625_p10 = scmp.lt.u32.totalorder %s1623_s14, %s1619_s11  ;;  %p1627_p12 = scmp.lt.u32.totalorder %s1619_s11, %s2036_s28 }
 0x4b3   : > { %p1621_p7 = pnand %p1620_p4, %p1748_p5 }
 0x4b4   : > { %p1626_p11 = por %p1625_p10, %p1624_p9 }
 0x4b5   : > { %p1622_p8 = pneg %p1621_p7 }
 0x4b6   : > { %p1628_p13 = por %p1627_p12, %p1626_p11 }
 0x4b8   : > { %p1629_p0 = pnand %p1628_p13, %p1622_p8 }
 0x4ba   : > { %1632 = shalt.err (!%p1629_p0)
}
 0x4bb   : > { %1463 = dma.vmem_to_hbm [thread:$0]  (%p1748_p5), %s2038_s17, 16, %s2036_s28, %s1190_s19  }
 0x4bc PF: > { %p1469_p1 = scmp.ge.s32.totalorder %s1667_s24, 2  ;;  %s1214_s16 = sand.u32 1, %s1655_s21  }
 0x4bd   : > { %s1215_s18 = scalar_lea.sflag [#allocation3], %s1214_s16 }
 0x4be   : > { %p1466_p2 = pnand %p1469_p1, %p1752_p6 }
 0x4c0   : > { %1650 = dma.done.wait (!%p1466_p2), %s1215_s18, 16  }
 0x4c1   : > { %1652 = vsyncadd (!%p1466_p2), %s1215_s18, 4294967280  ;;  %p16_p3 = scmp.ge.s32.totalorder %s1735_s27, 4   ;;  %s2087_s21 = smov %s1659_s22 }
 0x4c2   : > { %s2088_s22 = smov %s1663_s23  ;;  %s2089_s23 = smov %s1746_s30 }
 0x4c3   : > { %s2090_s24 = smov %s1735_s27  ;;  %18 = sbr.rel (!%p16_p3) target bundleno = 3 (0x3), region = 81 }
 0x4ca   :  { %1219 = vsyncpa [#allocation3], 1 }
 0x4cb   :  { %1221 = vsyncpa [#allocation3 + $0x1], 1 }

</bundles_post_ra>
